<compile_context>
chip_gen: v6e
topology: v6e:2x2x1
jax: 0.10.0
libtpu: 0.0.40
codegen_flags: <defaults>
</compile_context>

<pallas_src>
import math
from functools import partial

import jax
import jax.numpy as jnp
from jax.experimental import pallas as pl
from jax.experimental.pallas import tpu as pltpu

F32 = jnp.float32
BF16 = jnp.bfloat16
BN_EPS = 1e-5


# ----------------------------------------------------------------------------
# Pallas kernel: fused BallUnpooling over a tile of TM parent balls
#   x_ref      : (TM, in_dim)         parent features, bf16 (MXU operand)
#   ppos_ref   : (TM, stride*D)       parent positions pre-tiled per child, f32
#   cpos_ref   : (TM, stride*D)       child positions (row-major view), f32
#   cx_ref     : (TM, stride*out_dim) child features  (row-major view)
#   wx_ref     : (in_dim,   stride*out_dim)  bf16   (resident)
#   wr_ref     : (stride*D, stride*out_dim)  bf16   (resident)
#   consts_ref : (2, stride*out_dim)  f32  row0 = BN scale, row1 = bias+BN shift
#   o_ref      : (TM, stride*out_dim) = BN(child_x + proj([x, rel]))
# ----------------------------------------------------------------------------
def _ball_unpool_kernel(x_ref, ppos_ref, cpos_ref, cx_ref,
                        wx_ref, wr_ref, consts_ref, o_ref):
    # relative child positions in f32, cast to bf16 only as the MXU operand
    rel = (cpos_ref[...] - ppos_ref[...]).astype(wr_ref.dtype)

    # split-weight projection: [x, rel] @ W  ==  x @ W_x + rel @ W_rel
    y = jnp.dot(x_ref[...], wx_ref[...], preferred_element_type=jnp.float32)
    y = y + jnp.dot(rel, wr_ref[...], preferred_element_type=jnp.float32)

    # residual with children features, then folded (bias + eval-mode BN)
    z = cx_ref[...].astype(jnp.float32) + y
    o_ref[...] = (z * consts_ref[0:1, :] + consts_ref[1:2, :]).astype(o_ref.dtype)


# ----------------------------------------------------------------------------
# Tiling policy
# ----------------------------------------------------------------------------
_TILE_CANDIDATES = (4096, 2048, 1024, 512, 256, 128, 64, 32, 16, 8)


def _num_tensorcores():
    """Best-effort TensorCore count per chip (v7x = 2, v5e/v6e = 1)."""
    try:
        dev = jax.devices()[0]
        nc = getattr(dev, "num_cores", None)
        if nc:
            return int(nc)
        kind = str(getattr(dev, "device_kind", "")).lower()
        return 2 if ("v7" in kind or "7x" in kind) else 1
    except Exception:  # pragma: no cover
        return 1


def _pick_tile(n, row_bytes, num_tc, vmem_budget_bytes=8 * 1024 * 1024):
    """Rows per grid step. Largest tile that (a) fits the VMEM budget
    double-buffered, (b) yields >= num_tc grid steps so every TC gets work,
    (c) divides n when that costs at most 2x tile size (unmasked stores)."""
    max_rows = max(8, vmem_budget_bytes // max(1, 2 * row_bytes))
    if num_tc <= 1 and n <= max_rows:
        return n                                  # one full block: zero per-step overhead
    cap = min(max_rows, max(8, pl.cdiv(n, num_tc)))
    best = 8
    for t in _TILE_CANDIDATES:
        if t <= cap:
            best = t
            break
    for t in _TILE_CANDIDATES:                    # prefer divisors (full, unmasked blocks)
        if t <= cap and n % t == 0 and t * 2 >= best:
            return t
    return best                                   # non-divisor: Pallas masks the tail block


# ----------------------------------------------------------------------------
# Forward wrapper
# ----------------------------------------------------------------------------
def ball_unpooling_forward(node, params, *, stride, dimensionality=3, out_dtype=None):
    """node = {'x','pos','batch_idx','children':{'x','pos','batch_idx'}} -> children."""
    child = node['children']
    n, in_dim = node['x'].shape
    out_dim = child['x'].shape[1]
    md = stride * out_dim
    sd = stride * dimensionality
    assert child['x'].shape[0] == n * stride and child['pos'].shape[0] == n * stride
    out_dtype = out_dtype or child['x'].dtype

    # Activations: parent features go to HBM as bf16 (bit-identical to the
    # in-kernel bf16 cast), children keep their incoming dtype.
    parent_x = node['x'].astype(BF16)                                    # (n, in_dim)
    ppos_t = jnp.tile(node['pos'].astype(F32), (1, stride))              # (n, stride*D)
    # Free row-major views: the `stride` children of a parent are contiguous rows.
    cpos_v = child['pos'].astype(F32).reshape(n, sd)                     # (n, stride*D)
    cx_v = child['x'].reshape(n, md)                                     # (n, stride*out_dim)

    w_x = params['w_x'].astype(BF16)
    w_rel = params['w_rel'].astype(BF16)

    # Fold eval-mode BatchNorm + projection bias into per-channel scale/shift,
    # tiled per stride group, packed into one (2, md) resident constant.
    inv_std = jax.lax.rsqrt(params['bn_rv'] + BN_EPS)
    scale = params['bn_w'] * inv_std
    shift = params['bn_b'] - params['bn_rm'] * scale
    scale_t = jnp.tile(scale, stride)
    shift_t = jnp.tile(shift, stride) + params['b'].reshape(md) * scale_t
    consts = jnp.stack([scale_t, shift_t]).astype(F32)                   # (2, md)

    # Tile/grid policy (HBM-bandwidth-bound kernel).
    out_bytes = jnp.dtype(out_dtype).itemsize
    row_bytes = (in_dim * 2 + sd * 4 + sd * 4
                 + md * cx_v.dtype.itemsize + md * out_bytes)
    num_tc = _num_tensorcores()
    tm = min(_pick_tile(n, row_bytes, num_tc), n)
    grid = (pl.cdiv(n, tm),)

    row = lambda i: (i, 0)
    full = lambda i: (0, 0)

    cost = pl.CostEstimate(
        flops=2 * n * (in_dim + sd) * md + 4 * n * md,
        transcendentals=0,
        bytes_accessed=int(parent_x.size * 2 + ppos_t.size * 4 + cpos_v.size * 4
                           + cx_v.size * cx_v.dtype.itemsize
                           + w_x.size * 2 + w_rel.size * 2 + consts.size * 4
                           + n * md * out_bytes),
    )

    out = pl.pallas_call(
        _ball_unpool_kernel,
        out_shape=jax.ShapeDtypeStruct((n, md), out_dtype),
        grid=grid,
        in_specs=[
            pl.BlockSpec((tm, in_dim), row),          # parent x (bf16)
            pl.BlockSpec((tm, sd), row),              # parent pos, tiled per child
            pl.BlockSpec((tm, sd), row),              # child pos (view)
            pl.BlockSpec((tm, md), row),              # child x   (view)
            pl.BlockSpec((in_dim, md), full),         # W_x   (bf16, resident)
            pl.BlockSpec((sd, md), full),             # W_rel (bf16, resident)
            pl.BlockSpec((2, md), full),              # [BN scale; bias+BN shift]
        ],
        out_specs=pl.BlockSpec((tm, md), row),
        compiler_params=pltpu.CompilerParams(
            dimension_semantics=("parallel",),
            vmem_limit_bytes=32 * 1024 * 1024),
        cost_estimate=cost,
    )(parent_x, ppos_t, cpos_v, cx_v, w_x, w_rel, consts)

    new_child_x = out.reshape(n * stride, out_dim)    # free row-major reshape
    return {**child, 'x': new_child_x}


# ----------------------------------------------------------------------------
# Pure-JAX f32 reference (mirrors the torch module) for correctness checking
# ----------------------------------------------------------------------------
def ball_unpooling_reference(node, params, *, stride, dimensionality=3):
    child = node['children']
    n = node['x'].shape[0]
    out_dim = child['x'].shape[1]
    rel = (child['pos'].astype(F32).reshape(n, stride, dimensionality)
           - node['pos'].astype(F32)[:, None, :]).reshape(n, stride * dimensionality)
    w = jnp.concatenate([params['w_x'].astype(F32), params['w_rel'].astype(F32)], 0)
    xin = jnp.concatenate([node['x'].astype(F32), rel], axis=-1)
    y = (xin @ w + params['b']).reshape(n * stride, out_dim)
    z = child['x'].astype(F32) + y
    inv_std = jax.lax.rsqrt(params['bn_rv'] + BN_EPS)
    return (z - params['bn_rm']) * inv_std * params['bn_w'] + params['bn_b']


# ----------------------------------------------------------------------------
# Parameter construction (torch-style init, synthetic)
# ----------------------------------------------------------------------------
def init_ball_unpooling_params(key, in_dim, out_dim, stride, dimensionality=3,
                               matmul_dtype=jnp.bfloat16):
    kw, kb, kg, kbe, krm, krv = jax.random.split(key, 6)
    fan_in = in_dim + stride * dimensionality
    md = stride * out_dim
    w = 0.02 * jax.random.normal(kw, (fan_in, md), F32)      # trunc_normal-ish
    bound = 1.0 / math.sqrt(fan_in)
    b = jax.random.uniform(kb, (md,), F32, -bound, bound)
    return dict(
        w_x=w[:in_dim].astype(matmul_dtype),                 # split weight: features
        w_rel=w[in_dim:].astype(matmul_dtype),               # split weight: rel-pos
        b=b,
        bn_w=1.0 + 0.1 * jax.random.normal(kg, (out_dim,), F32),
        bn_b=0.1 * jax.random.normal(kbe, (out_dim,), F32),
        bn_rm=0.05 * jax.random.normal(krm, (out_dim,), F32),
        bn_rv=1.0 + 0.1 * jnp.abs(jax.random.normal(krv, (out_dim,), F32)),
    )


# ----------------------------------------------------------------------------
if __name__ == "__main__":
    DIM = 3          # dimensionality
    STRIDE = 2       # children per coarse ball
    IN_DIM = 128     # coarse-level (pooled) channels
    OUT_DIM = 64     # fine-level (children) channels -> stride*OUT_DIM = 128 lanes
    N_PARENT = 256
    N_CHILD = N_PARENT * STRIDE

    key = jax.random.PRNGKey(0)
    kx, kpp, kcx, kcp, kp = jax.random.split(key, 5)

    parent_x = jax.random.normal(kx, (N_PARENT, IN_DIM), F32)
    parent_pos = jax.random.normal(kpp, (N_PARENT, DIM), F32)
    child_x = jax.random.normal(kcx, (N_CHILD, OUT_DIM), F32)
    child_pos = (jnp.repeat(parent_pos, STRIDE, axis=0)
                 + 0.1 * jax.random.normal(kcp, (N_CHILD, DIM), F32))

    node = dict(
        x=parent_x, pos=parent_pos,
        batch_idx=jnp.zeros((N_PARENT,), jnp.int32),
        children=dict(x=child_x, pos=child_pos,
                      batch_idx=jnp.zeros((N_CHILD,), jnp.int32)),
    )

    params = init_ball_unpooling_params(kp, IN_DIM, OUT_DIM, STRIDE, DIM)

    out_child = ball_unpooling_forward(node, params, stride=STRIDE, dimensionality=DIM)
    out = jax.block_until_ready(out_child['x'])

    ref = ball_unpooling_reference(node, params, stride=STRIDE, dimensionality=DIM)

    assert out.shape == (N_CHILD, OUT_DIM), out.shape
    assert bool(jnp.all(jnp.isfinite(out)))
    max_err = float(jnp.max(jnp.abs(out.astype(F32) - ref)))
    assert bool(jnp.allclose(out.astype(F32), ref, atol=1e-2, rtol=1e-2)), max_err
    print("KERNEL_OK")
</pallas_src>

<mosaic_0001>
module attributes {stable_mosaic.version = 11 : i64} {
  func.func @_ball_unpool_kernel(%arg0: i32, %arg1: memref<256x128xbf16, #tpu.memory_space<vmem>>, %arg2: memref<256x6xf32, #tpu.memory_space<vmem>>, %arg3: memref<256x6xf32, #tpu.memory_space<vmem>>, %arg4: memref<256x128xf32, #tpu.memory_space<vmem>>, %arg5: memref<128x128xbf16, #tpu.memory_space<vmem>>, %arg6: memref<6x128xbf16, #tpu.memory_space<vmem>>, %arg7: memref<2x128xf32, #tpu.memory_space<vmem>>, %arg8: memref<256x128xf32, #tpu.memory_space<vmem>>) attributes {dimension_semantics = [#tpu.dimension_semantics<parallel>], iteration_bounds = array<i64: 1>, scalar_prefetch = 0 : i64, scratch_operands = 0 : i64, tpu.core_type = #tpu.core_type<tc>, window_params = [{transform_indices = @transform_0, window_bounds = array<i64: 256, 128>}, {transform_indices = @transform_1, window_bounds = array<i64: 256, 6>}, {transform_indices = @transform_2, window_bounds = array<i64: 256, 6>}, {transform_indices = @transform_3, window_bounds = array<i64: 256, 128>}, {pipeline_mode = #tpu.pipeline_mode<synchronous>, transform_indices = @transform_4, window_bounds = array<i64: 128, 128>}, {pipeline_mode = #tpu.pipeline_mode<synchronous>, transform_indices = @transform_5, window_bounds = array<i64: 6, 128>}, {pipeline_mode = #tpu.pipeline_mode<synchronous>, transform_indices = @transform_6, window_bounds = array<i64: 2, 128>}, {transform_indices = @transform_7, window_bounds = array<i64: 256, 128>}]} {
    %c0 = arith.constant 0 : index
    %c0_0 = arith.constant 0 : index
    %0 = vector.load %arg3[%c0, %c0_0] : memref<256x6xf32, #tpu.memory_space<vmem>>, vector<256x6xf32>
    %c0_1 = arith.constant 0 : index
    %c0_2 = arith.constant 0 : index
    %1 = vector.load %arg2[%c0_1, %c0_2] : memref<256x6xf32, #tpu.memory_space<vmem>>, vector<256x6xf32>
    %2 = arith.subf %0, %1 : vector<256x6xf32>
    %3 = arith.truncf %2 : vector<256x6xf32> to vector<256x6xbf16>
    %c0_3 = arith.constant 0 : index
    %c0_4 = arith.constant 0 : index
    %4 = vector.load %arg1[%c0_3, %c0_4] : memref<256x128xbf16, #tpu.memory_space<vmem>>, vector<256x128xbf16>
    %c0_5 = arith.constant 0 : index
    %c0_6 = arith.constant 0 : index
    %5 = vector.load %arg5[%c0_5, %c0_6] : memref<128x128xbf16, #tpu.memory_space<vmem>>, vector<128x128xbf16>
    %cst = arith.constant dense<0.000000e+00> : vector<256x128xf32>
    %6 = tpu.matmul %4, %5, %cst {dimension_numbers = #tpu.dot_dimension_numbers<[1], [0], [0], [1], [0, 0, 1, 1], [], []>} : vector<256x128xbf16>, vector<128x128xbf16>, vector<256x128xf32> -> vector<256x128xf32>
    %c0_7 = arith.constant 0 : index
    %c0_8 = arith.constant 0 : index
    %7 = vector.load %arg6[%c0_7, %c0_8] : memref<6x128xbf16, #tpu.memory_space<vmem>>, vector<6x128xbf16>
    %cst_9 = arith.constant dense<0.000000e+00> : vector<256x128xf32>
    %8 = tpu.matmul %3, %7, %cst_9 {dimension_numbers = #tpu.dot_dimension_numbers<[1], [0], [0], [1], [0, 0, 1, 1], [], []>} : vector<256x6xbf16>, vector<6x128xbf16>, vector<256x128xf32> -> vector<256x128xf32>
    %9 = arith.addf %6, %8 : vector<256x128xf32>
    %c0_10 = arith.constant 0 : index
    %c0_11 = arith.constant 0 : index
    %10 = vector.load %arg4[%c0_10, %c0_11] : memref<256x128xf32, #tpu.memory_space<vmem>>, vector<256x128xf32>
    %11 = arith.addf %10, %9 : vector<256x128xf32>
    %c0_12 = arith.constant 0 : index
    %c0_13 = arith.constant 0 : index
    %12 = vector.load %arg7[%c0_12, %c0_13] : memref<2x128xf32, #tpu.memory_space<vmem>>, vector<1x128xf32>
    %13 = vector.broadcast %12 : vector<1x128xf32> to vector<256x128xf32>
    %14 = arith.mulf %11, %13 : vector<256x128xf32>
    %c1 = arith.constant 1 : index
    %c0_14 = arith.constant 0 : index
    %15 = vector.load %arg7[%c1, %c0_14] : memref<2x128xf32, #tpu.memory_space<vmem>>, vector<1x128xf32>
    %16 = vector.broadcast %15 : vector<1x128xf32> to vector<256x128xf32>
    %17 = arith.addf %14, %16 : vector<256x128xf32>
    %c0_15 = arith.constant 0 : index
    %c0_16 = arith.constant 0 : index
    %18 = vector.load %arg8[%c0_15, %c0_16] : memref<256x128xf32, #tpu.memory_space<vmem>>, vector<256x128xf32>
    tpu.vector_store %arg8[%c0_15, %c0_16], %17 {strides = array<i32>} : memref<256x128xf32, #tpu.memory_space<vmem>>, vector<256x128xf32>,
    return
  }
  func.func @transform_0(%arg0: i32) -> (i32, i32) {
    %c0_i32 = arith.constant 0 : i32
    %c0_i32_0 = arith.constant 0 : i32
    return %arg0, %c0_i32 : i32, i32
  }
  func.func @transform_1(%arg0: i32) -> (i32, i32) {
    %c0_i32 = arith.constant 0 : i32
    %c0_i32_0 = arith.constant 0 : i32
    return %arg0, %c0_i32 : i32, i32
  }
  func.func @transform_2(%arg0: i32) -> (i32, i32) {
    %c0_i32 = arith.constant 0 : i32
    %c0_i32_0 = arith.constant 0 : i32
    return %arg0, %c0_i32 : i32, i32
  }
  func.func @transform_3(%arg0: i32) -> (i32, i32) {
    %c0_i32 = arith.constant 0 : i32
    %c0_i32_0 = arith.constant 0 : i32
    return %arg0, %c0_i32 : i32, i32
  }
  func.func @transform_4(%arg0: i32) -> (i32, i32) {
    %c0_i32 = arith.constant 0 : i32
    %c0_i32_0 = arith.constant 0 : i32
    %c0_i32_1 = arith.constant 0 : i32
    return %c0_i32, %c0_i32_0 : i32, i32
  }
  func.func @transform_5(%arg0: i32) -> (i32, i32) {
    %c0_i32 = arith.constant 0 : i32
    %c0_i32_0 = arith.constant 0 : i32
    %c0_i32_1 = arith.constant 0 : i32
    return %c0_i32, %c0_i32_0 : i32, i32
  }
  func.func @transform_6(%arg0: i32) -> (i32, i32) {
    %c0_i32 = arith.constant 0 : i32
    %c0_i32_0 = arith.constant 0 : i32
    %c0_i32_1 = arith.constant 0 : i32
    return %c0_i32, %c0_i32_0 : i32, i32
  }
  func.func @transform_7(%arg0: i32) -> (i32, i32) {
    %c0_i32 = arith.constant 0 : i32
    %c0_i32_0 = arith.constant 0 : i32
    return %arg0, %c0_i32 : i32, i32
  }
}

</mosaic_0001>

<bundles_post_ra>
// kernel: tpu_custom_call.1
= control target key start
LH: loop header
LB: loop body
LE: loop exit
PB: predicated region body
PF: predicated region fallthrough
CT: control target
= control target key end

     0   :  { %vm238_vm0 = vcmask 1042432   ;;  %vm189_vm1 = vcmask 48128   ;;  %s1696_s0 = inlined_call_operand.vmem [shape: bf16[256,128], index: 0, kind: input, shape index: {}]   ;;  %s1697_s1 = inlined_call_operand.vmem [shape: f32[256,6], index: 1, kind: input, shape index: {}]   ;;  %s1698_s2 = inlined_call_operand.vmem [shape: f32[256,6], index: 2, kind: input, shape index: {}]   ;;  %s1699_s3 = inlined_call_operand.vmem [shape: f32[256,128], index: 3, kind: input, shape index: {}]   ;;  %s1700_s4 = inlined_call_operand.vmem [shape: bf16[128,128], index: 4, kind: input, shape index: {}]   ;;  %s1701_s5 = inlined_call_operand.vmem [shape: bf16[6,128], index: 5, kind: input, shape index: {}]   ;;  %s1702_s6 = inlined_call_operand.vmem [shape: f32[2,128], index: 6, kind: input, shape index: {}]   ;;  %s1703_s7 = inlined_call_operand.hbm [shape: f32[256,128], index: 7, kind: output, shape index: {}]  }
   0x1   :  { %v188_v0 = vld [vmem:[%s1701_s5] sm:$0x7]  ;;  %v1079_v1 = vld [vmem:[%s1700_s4 + $0x38] sm:$0xff]   ;;  %v29_v4 = vld [vmem:[%s1698_s2 + $0x8] sm:$0xff] }
   0x2   :  { %1075 = vmatprep.subr.msk.bf16.mxu0 %vm238_vm0, %v188_v0  ;;  %v240_v2 = vsel %vm238_vm0, %v188_v0, 0  ;;  %v28_v3 = vld [vmem:[%s1698_s2] sm:$0xff]  ;;  %1059 = vmatprep.subr.bf16.mxu1 %v1079_v1  ;;  %v61_v6 = vld [vmem:[%s1697_s1 + $0x8] sm:$0xff]  ;;  %v30_v7 = vld [vmem:[%s1698_s2 + $0x10] sm:$0xff] }
   0x3   :  { %978 = vmatpush3.bf16.msra.mxu0 %v240_v2  ;;  %v60_v5 = vld [vmem:[%s1697_s1] sm:$0xff]  ;;  %1067 = vmatpush3.bf16.msra.mxu1 %v1079_v1  ;;  %v93_v9 = vsub.f32 %v29_v4, %v61_v6  ;;  %v31_v10 = vld [vmem:[%s1698_s2 + $0x18] sm:$0xff]  ;;  %v62_v11 = vld [vmem:[%s1697_s1 + $0x10] sm:$0xff] }
   0x4   :  { %v92_v8 = vsub.f32 %v28_v3, %v60_v5  ;;  %v63_v12 = vld [vmem:[%s1697_s1 + $0x18] sm:$0xff]  ;;  %1011 = vmatprep.subr.bf16.mxu0 %v1079_v1  ;;  %v94_v13 = vsub.f32 %v30_v7, %v62_v11  ;;  %v1080_v15 = vld [vmem:[%s1700_s4 + $0x30] sm:$0xff]   ;;  %v1081_v17 = vld [vmem:[%s1700_s4 + $0x28] sm:$0xff]  }
   0x5   :  { %v95_v14 = vsub.f32 %v31_v10, %v63_v12  ;;  %1060 = vmatprep.subr.bf16.mxu1 %v1080_v15  ;;  %v32_v19 = vld [vmem:[%s1698_s2 + $0x20] sm:$0xff]  ;;  %v33_v20 = vld [vmem:[%s1698_s2 + $0x28] sm:$0xff]  ;;  %v34_v24 = vld [vmem:[%s1698_s2 + $0x30] sm:$0xff] }
   0x6   :  { %v124_v16 = vpack.c.bf16 %v93_v9, %v92_v8  ;;  %v64_v21 = vld [vmem:[%s1697_s1 + $0x20] sm:$0xff]  ;;  %v65_v22 = vld [vmem:[%s1697_s1 + $0x28] sm:$0xff]  ;;  %v35_v25 = vld [vmem:[%s1698_s2 + $0x38] sm:$0xff] }
   0x7   :  { %v125_v18 = vpack.c.bf16 %v95_v14, %v94_v13  ;;  %1068 = vmatpush3.bf16.msra.mxu1 %v1080_v15  ;;  %v96_v23 = vsub.f32 %v32_v19, %v64_v21  ;;  %v97_v26 = vsub.f32 %v33_v20, %v65_v22  ;;  %v66_v27 = vld [vmem:[%s1697_s1 + $0x30] sm:$0xff]  ;;  %v67_v28 = vld [vmem:[%s1697_s1 + $0x38] sm:$0xff]  ;;  %v1082_v31 = vld [vmem:[%s1700_s4 + $0x20] sm:$0xff]  }
   0x8   :  { %979 = vmatprep.mubr.msk.bf16.mxu0 %vm189_vm1, %v124_v16  ;;  %1061 = vmatprep.subr.bf16.mxu1 %v1081_v17  ;;  %v98_v29 = vsub.f32 %v34_v24, %v66_v27  ;;  %v99_v30 = vsub.f32 %v35_v25, %v67_v28  ;;  %v1083_v33 = vld [vmem:[%s1700_s4 + $0x18] sm:$0xff]   ;;  %v36_v34 = vld [vmem:[%s1698_s2 + $0x40] sm:$0xff]  ;;  %v37_v35 = vld [vmem:[%s1698_s2 + $0x48] sm:$0xff] }
   0x9   :  { %980 = vmatmul.mubr.msk.bf16.vlgmr.msra.gmra.mxu0 %vm189_vm1, %v125_v18  ;;  %v126_v32 = vpack.c.bf16 %v97_v26, %v96_v23  ;;  %v68_v36 = vld [vmem:[%s1697_s1 + $0x40] sm:$0xff]  ;;  %v69_v37 = vld [vmem:[%s1697_s1 + $0x48] sm:$0xff]  ;;  %v38_v41 = vld [vmem:[%s1698_s2 + $0x50] sm:$0xff] }
   0xa   :  { %1012 = vmatpush3.bf16.msra.mxu0 %v1079_v1  ;;  %v127_v38 = vpack.c.bf16 %v99_v30, %v98_v29  ;;  %v100_v39 = vsub.f32 %v36_v34, %v68_v36  ;;  %v101_v40 = vsub.f32 %v37_v35, %v69_v37  ;;  %v39_v42 = vld [vmem:[%s1698_s2 + $0x58] sm:$0xff]  ;;  %v70_v43 = vld [vmem:[%s1697_s1 + $0x50] sm:$0xff]  ;;  %v40_v46 = vld [vmem:[%s1698_s2 + $0x60] sm:$0xff] }
   0xb   :  { %1013 = vmatprep.subr.bf16.mxu0 %v1080_v15  ;;  %1069 = vmatpush3.bf16.msra.mxu1 %v1081_v17  ;;  %v71_v44 = vld [vmem:[%s1697_s1 + $0x58] sm:$0xff]  ;;  %v41_v47 = vld [vmem:[%s1698_s2 + $0x68] sm:$0xff]  ;;  %v102_v48 = vsub.f32 %v38_v41, %v70_v43  ;;  %v1084_v50 = vld [vmem:[%s1700_s4 + $0x10] sm:$0xff]  }
   0xc   :  { %983 = vmatprep.mubr.msk.bf16.mxu0 %vm189_vm1, %v126_v32  ;;  %1062 = vmatprep.subr.bf16.mxu1 %v1082_v31  ;;  %v128_v45 = vpack.c.bf16 %v101_v40, %v100_v39  ;;  %v103_v49 = vsub.f32 %v39_v42, %v71_v44  ;;  %v72_v51 = vld [vmem:[%s1697_s1 + $0x60] sm:$0xff]  ;;  %v73_v52 = vld [vmem:[%s1697_s1 + $0x68] sm:$0xff]  ;;  %v42_v56 = vld [vmem:[%s1698_s2 + $0x70] sm:$0xff] }
   0xd   :  { %v104_v53 = vsub.f32 %v40_v46, %v72_v51  ;;  %v105_v54 = vsub.f32 %v41_v47, %v73_v52  ;;  %v1085_v55 = vld [vmem:[%s1700_s4 + $0x8] sm:$0xff]   ;;  %v1087_v57 = vld [vmem:[%s1696_s0 + $0x10] sm:$0xff]   ;;  %v43_v59 = vld [vmem:[%s1698_s2 + $0x78] sm:$0xff] }
   0xe   :  { %1014 = vmatpush3.bf16.msra.mxu0 %v1080_v15  ;;  %v129_v58 = vpack.c.bf16 %v103_v49, %v102_v48  ;;  %v74_v61 = vld [vmem:[%s1697_s1 + $0x70] sm:$0xff]  ;;  %v75_v62 = vld [vmem:[%s1697_s1 + $0x78] sm:$0xff]  ;;  %1031 = vmatprep.mubr.bf16.mxu1 %v1087_v57  ;;  %v44_v63 = vld [vmem:[%s1698_s2 + $0x80] sm:$0xff] }
   0xf   :  { %1015 = vmatprep.subr.bf16.mxu0 %v1081_v17  ;;  %1070 = vmatpush3.bf16.msra.mxu1 %v1082_v31  ;;  %v130_v60 = vpack.c.bf16 %v105_v54, %v104_v53  ;;  %v45_v0 = vld [vmem:[%s1698_s2 + $0x88] sm:$0xff]  ;;  %v76_v1 = vld [vmem:[%s1697_s1 + $0x80] sm:$0xff]  ;;  %v106_v3 = vsub.f32 %v42_v56, %v74_v61  ;;  %v107_v4 = vsub.f32 %v43_v59, %v75_v62  ;;  %v46_v8 = vld [vmem:[%s1698_s2 + $0x90] sm:$0xff] }
  0x10   :  { %1063 = vmatprep.subr.bf16.mxu1 %v1083_v33  ;;  %v77_v2 = vld [vmem:[%s1697_s1 + $0x88] sm:$0xff]  ;;  %v1086_v5 = vld [vmem:[%s1700_s4] sm:$0xff]   ;;  %v108_v6 = vsub.f32 %v44_v63, %v76_v1  ;;  %v47_v9 = vld [vmem:[%s1698_s2 + $0x98] sm:$0xff] }
  0x11   :  { %984 = vmatmul.mubr.msk.bf16.gmra.mxu0 %vm189_vm1, %v127_v38  ;;  %v109_v7 = vsub.f32 %v45_v0, %v77_v2  ;;  %v78_v10 = vld [vmem:[%s1697_s1 + $0x90] sm:$0xff]  ;;  %v131_v11 = vpack.c.bf16 %v107_v4, %v106_v3  ;;  %v1088_v12 = vld [vmem:[%s1696_s0 + $0x18] sm:$0xff]   ;;  %v48_v15 = vld [vmem:[%s1698_s2 + $0xa0] sm:$0xff] }
  0x12   :  { %987 = vmatprep.mubr.msk.bf16.mxu0 %vm189_vm1, %v128_v45  ;;  %1016 = vmatpush3.bf16.msra.mxu0 %v1081_v17  ;;  %v79_v13 = vld [vmem:[%s1697_s1 + $0x98] sm:$0xff]  ;;  %v49_v16 = vld [vmem:[%s1698_s2 + $0xa8] sm:$0xff]  ;;  %v80_v17 = vld [vmem:[%s1697_s1 + $0xa0] sm:$0xff]  ;;  %v110_v20 = vsub.f32 %v46_v8, %v78_v10 }
  0x13   :  { %1017 = vmatprep.subr.bf16.mxu0 %v1082_v31  ;;  %1071 = vmatpush3.bf16.msra.mxu1 %v1083_v33  ;;  %v132_v14 = vpack.c.bf16 %v109_v7, %v108_v6  ;;  %v81_v18 = vld [vmem:[%s1697_s1 + $0xa8] sm:$0xff]  ;;  %v1089_v19 = vld [vmem:[%s1696_s0 + $0x20] sm:$0xff]   ;;  %v111_v21 = vsub.f32 %v47_v9, %v79_v13  ;;  %v112_v22 = vsub.f32 %v48_v15, %v80_v17  ;;  %v50_v24 = vld [vmem:[%s1698_s2 + $0xb0] sm:$0xff] }
  0x14   :  { %1064 = vmatprep.subr.bf16.mxu1 %v1084_v50  ;;  %v113_v23 = vsub.f32 %v49_v16, %v81_v18  ;;  %v51_v25 = vld [vmem:[%s1698_s2 + $0xb8] sm:$0xff]  ;;  %v1090_v27 = vld [vmem:[%s1696_s0 + $0x28] sm:$0xff]   ;;  %v82_v28 = vld [vmem:[%s1697_s1 + $0xb0] sm:$0xff] }
  0x15   :  { %v133_v26 = vpack.c.bf16 %v111_v21, %v110_v20  ;;  %v83_v29 = vld [vmem:[%s1697_s1 + $0xb8] sm:$0xff]  ;;  %v52_v30 = vld [vmem:[%s1698_s2 + $0xc0] sm:$0xff]  ;;  %v53_v32 = vld [vmem:[%s1698_s2 + $0xc8] sm:$0xff]  ;;  %v114_v36 = vsub.f32 %v50_v24, %v82_v28 }
  0x16   :  { %1018 = vmatpush3.bf16.msra.mxu0 %v1082_v31  ;;  %v134_v31 = vpack.c.bf16 %v113_v23, %v112_v22  ;;  %v85_v34 = vld [vmem:[%s1697_s1 + $0xc8] sm:$0xff]  ;;  %v1091_v35 = vld [vmem:[%s1696_s0 + $0x30] sm:$0xff]   ;;  %v115_v37 = vsub.f32 %v51_v25, %v83_v29  ;;  %v55_v41 = vld [vmem:[%s1698_s2 + $0xd8] sm:$0xff] }
  0x17   :  { %1019 = vmatprep.subr.bf16.mxu0 %v1083_v33  ;;  %1072 = vmatpush3.bf16.msra.mxu1 %v1084_v50  ;;  %v117_v39 = vsub.f32 %v53_v32, %v85_v34  ;;  %v54_v40 = vld [vmem:[%s1698_s2 + $0xd0] sm:$0xff]  ;;  %v1092_v44 = vld [vmem:[%s1696_s0 + $0x38] sm:$0xff]   ;;  %v56_v47 = vld [vmem:[%s1698_s2 + $0xe0] sm:$0xff] }
  0x18   :  { %1065 = vmatprep.subr.bf16.mxu1 %v1085_v55  ;;  %v86_v42 = vld [vmem:[%s1697_s1 + $0xd0] sm:$0xff]  ;;  %v135_v43 = vpack.c.bf16 %v115_v37, %v114_v36  ;;  %v87_v45 = vld [vmem:[%s1697_s1 + $0xd8] sm:$0xff] }
  0x19   :  { %988 = vmatmul.mubr.msk.bf16.gmra.mxu0 %vm189_vm1, %v129_v58 }
  0x1a   :  { %991 = vmatprep.mubr.msk.bf16.mxu0 %vm189_vm1, %v130_v60  ;;  %1020 = vmatpush3.bf16.msra.mxu0 %v1083_v33  ;;  %v84_v33 = vld [vmem:[%s1697_s1 + $0xc0] sm:$0xff] }
  0x1b   :  { %1021 = vmatprep.subr.bf16.mxu0 %v1084_v50  ;;  %1073 = vmatpush3.bf16.msra.mxu1 %v1085_v55  ;;  %v116_v38 = vsub.f32 %v52_v30, %v84_v33 }
  0x1c   :  { %1066 = vmatprep.subr.bf16.mxu1 %v1086_v5 }
  0x1d   :  { %v136_v46 = vpack.c.bf16 %v117_v39, %v116_v38 }
  0x1e   :  { %1022 = vmatpush3.bf16.msra.mxu0 %v1084_v50 }
  0x1f   :  { %1023 = vmatprep.subr.bf16.mxu0 %v1085_v55  ;;  %1074 = vmatpush3.bf16.msra.mxu1 %v1086_v5 }
  0x21   :  { %992 = vmatmul.mubr.msk.bf16.gmra.mxu0 %vm189_vm1, %v131_v11 }
  0x22   :  { %995 = vmatprep.mubr.msk.bf16.mxu0 %vm189_vm1, %v132_v14  ;;  %1024 = vmatpush3.bf16.msra.mxu0 %v1085_v55 }
  0x23   :  { %1032 = vmatmul.mubr.bf16.vlgmr.msra.gmra.mxu1 %v1088_v12  ;;  %1025 = vmatprep.subr.bf16.mxu0 %v1086_v5 }
  0x24   :  { %1035 = vmatprep.mubr.bf16.mxu1 %v1089_v19 }
  0x26   :  { %1026 = vmatpush3.bf16.msra.mxu0 %v1086_v5 }
  0x29   :  { %996 = vmatmul.mubr.msk.bf16.gmra.mxu0 %vm189_vm1, %v133_v26 }
  0x2a   :  { %999 = vmatprep.mubr.msk.bf16.mxu0 %vm189_vm1, %v134_v31 }
  0x2b   :  { %1036 = vmatmul.mubr.bf16.gmra.mxu1 %v1090_v27 }
  0x2c   :  { %1039 = vmatprep.mubr.bf16.mxu1 %v1091_v35 }
  0x2d   :  { %12 = vsyncpa [#allocation3], 0  ;;  %v57_v48 = vld [vmem:[%s1698_s2 + $0xe8] sm:$0xff]  ;;  %v88_v49 = vld [vmem:[%s1697_s1 + $0xe0] sm:$0xff]  ;;  %v118_v52 = vsub.f32 %v54_v40, %v86_v42  ;;  %v119_v53 = vsub.f32 %v55_v41, %v87_v45  ;;  %s1125_s13 = smov [#allocation2]  }
  0x2e   :  { %v89_v50 = vld [vmem:[%s1697_s1 + $0xe8] sm:$0xff]  ;;  %v1093_v51 = vld [vmem:[%s1696_s0 + $0x40] sm:$0xff]   ;;  %v120_v54 = vsub.f32 %v56_v47, %v88_v49  ;;  %v58_v57 = vld [vmem:[%s1698_s2 + $0xf0] sm:$0xff]  ;;  %s883_s14 = sshll.u32 %s1125_s13, 4  ;;  %s884_s14 = int_to_ptr.vmem [resolvable:$true] %s883_s14 }
  0x2f   :  { %v121_v55 = vsub.f32 %v57_v48, %v89_v50  ;;  %v137_v56 = vpack.c.bf16 %v119_v53, %v118_v52  ;;  %v59_v59 = vld [vmem:[%s1698_s2 + $0xf8] sm:$0xff]  ;;  %v90_v60 = vld [vmem:[%s1697_s1 + $0xf0] sm:$0xff]  ;;  %v1094_v62 = vld [vmem:[%s1696_s0 + $0x48] sm:$0xff]   ;;  %p1108_p1 = scmp.lt.s32.totalorder %s884_s14, %s884_s14 }
  0x30   :  { %v91_v61 = vld [vmem:[%s1697_s1 + $0xf8] sm:$0xff]  ;;  %v1095_v63 = vld [vmem:[%s1696_s0 + $0x50] sm:$0xff]   ;;  %v122_v0 = vsub.f32 %v58_v57, %v90_v60  ;;  %v1097_v3 = vld [vmem:[%s1696_s0] sm:$0xff]  }
  0x31   :  { %1000 = vmatmul.mubr.msk.bf16.gmra.mxu0 %vm189_vm1, %v135_v43  ;;  %v138_v58 = vpack.c.bf16 %v121_v55, %v120_v54  ;;  %v123_v1 = vsub.f32 %v59_v59, %v91_v61  ;;  %v1096_v4 = vld [vmem:[%s1696_s0 + $0x58] sm:$0xff]   ;;  %v1099_v5 = vld [vmem:[%s1696_s0 + $0x60] sm:$0xff]   ;;  %v1098_v6 = vld [vmem:[%s1696_s0 + $0x8] sm:$0xff]  }
  0x32   :  { %1003 = vmatprep.mubr.msk.bf16.mxu0 %vm189_vm1, %v136_v46  ;;  %v1100_v7 = vld [vmem:[%s1696_s0 + $0x68] sm:$0xff]   ;;  %v1101_v8 = vld [vmem:[%s1696_s0 + $0x70] sm:$0xff]   ;;  %v1102_v9 = vld [vmem:[%s1696_s0 + $0x78] sm:$0xff]  }
  0x33   :  { %1040 = vmatmul.mubr.bf16.gmra.mxu1 %v1092_v44  ;;  %v139_v2 = vpack.c.bf16 %v123_v1, %v122_v0  ;;  %v714_v25 = vld [vmem:[%s1699_s3 + $0x30] sm:$0xff]  ;;  %v1471_v28 = vld [vmem:[%s1702_s6] ss:$0 sm:$0xff]  ;;  %v1479_v33 = vld [vmem:[%s1702_s6 + $0x1] ss:$0 sm:$0xff] }
  0x34   :  { %1043 = vmatprep.mubr.bf16.mxu1 %v1093_v51  ;;  %v712_v30 = vld [vmem:[%s1699_s3 + $0x20] sm:$0xff]  ;;  %v715_v36 = vld [vmem:[%s1699_s3 + $0x38] sm:$0xff]  ;;  %v713_v42 = vld [vmem:[%s1699_s3 + $0x28] sm:$0xff] }
  0x35   :  { %v718_v49 = vld [vmem:[%s1699_s3 + $0x50] sm:$0xff] }
  0x39   :  { %1004 = vmatmul.mubr.msk.bf16.gmra.mxu0 %vm189_vm1, %v137_v56  ;;  %v716_v56 = vld [vmem:[%s1699_s3 + $0x40] sm:$0xff] }
  0x3a   :  { %1007 = vmatprep.mubr.msk.bf16.mxu0 %vm189_vm1, %v138_v58 }
  0x3b   :  { %1044 = vmatmul.mubr.bf16.gmra.mxu1 %v1094_v62 }
  0x3c   :  { %1047 = vmatprep.mubr.bf16.mxu1 %v1095_v63  ;;  %v719_v63 = vld [vmem:[%s1699_s3 + $0x58] sm:$0xff] }
  0x41   :  { %1008 = vmatmul.mubr.msk.bf16.gmra.mxu0 %vm189_vm1, %v139_v2 }
  0x42   :  { %1027 = vmatprep.mubr.bf16.mxu0 %v1097_v3 }
  0x43   :  { %1048 = vmatmul.mubr.bf16.gmra.mxu1 %v1096_v4 }
  0x44   :  { %1051 = vmatprep.mubr.bf16.mxu1 %v1099_v5 }
  0x49   :  { %1028 = vmatmul.mubr.bf16.vlgmr.msra.gmra.mxu0 %v1098_v6  ;;  %v717_v6 = vld [vmem:[%s1699_s3 + $0x48] sm:$0xff] }
  0x4b   :  { %1052 = vmatmul.mubr.bf16.gmra.mxu1 %v1100_v7 }
  0x4c   :  { %1055 = vmatprep.mubr.bf16.mxu1 %v1101_v8 }
  0x53   :  { %1056 = vmatmul.mubr.bf16.gmra.mxu1 %v1102_v9 }
  0xc9   :  { %v1451_v10 = vpop.f32.mrf.mxu0 }
  0xcb   :  { %v1453_v11 = vpop.f32.mrf.mxu0 }
  0xcd   :  { %v1455_v12 = vpop.f32.mrf.mxu0 }
  0xcf   :  { %v1457_v13 = vpop.f32.mrf.mxu0 }
  0xd1   :  { %v985_v14 = vpop.f32.mrf.mxu0 }
  0xd3   :  { %v292_v15 = vpop.f32.mrf.mxu0 }
  0xd5   :  { %v986_v16 = vpop.f32.mrf.mxu0 }
  0xd7   :  { %v295_v17 = vpop.f32.mrf.mxu0 }
  0xd9   :  { %v989_v18 = vpop.f32.mrf.mxu0 }
  0xdb   :  { %v308_v19 = vpop.f32.mrf.mxu0 }
  0xdd   :  { %v990_v20 = vpop.f32.mrf.mxu0 }
  0xdf   :  { %v311_v21 = vpop.f32.mrf.mxu0 }
  0xe1   :  { %v1459_v22 = vpop.f32.mrf.mxu0 }
  0xe3   :  { %v1461_v23 = vpop.f32.mrf.mxu0  ;;  %v1033_v24 = vpop.f32.mrf.mxu1 }
  0xe4   :  { %v606_v26 = vadd.f32 %v1033_v24, %v985_v14 }
  0xe5   :  { %v1466_v27 = vpop.f32.mrf.mxu0  ;;  %v597_v29 = vpop.f32.mrf.mxu1 }
  0xe6   :  { %v746_v31 = vadd.f32 %v714_v25, %v606_v26  ;;  %v598_v32 = vadd.f32 %v597_v29, %v292_v15 }
  0xe7   :  { %v1481_v34 = vpop.f32.mrf.mxu0  ;;  %v1034_v35 = vpop.f32.mrf.mxu1 }
  0xe8   :  { %v783_v37 = vmul.f32 %v1471_v28, %v746_v31  ;;  %v744_v38 = vadd.f32 %v712_v30, %v598_v32  ;;  %v609_v39 = vadd.f32 %v1034_v35, %v986_v16 }
  0xe9   :  { %v1487_v40 = vpop.f32.mrf.mxu0  ;;  %v600_v41 = vpop.f32.mrf.mxu1 }
  0xea   :  { %v820_v43 = vadd.f32 %v1479_v33, %v783_v37  ;;  %v781_v44 = vmul.f32 %v1471_v28, %v744_v38  ;;  %v747_v45 = vadd.f32 %v715_v36, %v609_v39  ;;  %v601_v46 = vadd.f32 %v600_v41, %v295_v17  ;;  %v722_v17 = vld [vmem:[%s1699_s3 + $0x70] sm:$0xff] }
  0xeb   :  { %v1494_v47 = vpop.f32.mrf.mxu0  ;;  %v1037_v48 = vpop.f32.mrf.mxu1 }
  0xec   :  { %852 = vst [vmem:[#allocation2 + $0x30] sm:$0xff] %v820_v43  ;;  %v818_v50 = vadd.f32 %v1479_v33, %v781_v44  ;;  %v784_v51 = vmul.f32 %v1471_v28, %v747_v45  ;;  %v745_v52 = vadd.f32 %v713_v42, %v601_v46  ;;  %v622_v53 = vadd.f32 %v1037_v48, %v989_v18 }
  0xed   :  { %v1501_v54 = vpop.f32.mrf.mxu0  ;;  %v613_v55 = vpop.f32.mrf.mxu1 }
  0xee   :  { %850 = vst [vmem:[#allocation2 + $0x20] sm:$0xff] %v818_v50  ;;  %v821_v57 = vadd.f32 %v1479_v33, %v784_v51  ;;  %v782_v58 = vmul.f32 %v1471_v28, %v745_v52  ;;  %v750_v59 = vadd.f32 %v718_v49, %v622_v53  ;;  %v614_v60 = vadd.f32 %v613_v55, %v308_v19 }
  0xef   :  { %v1508_v61 = vpop.f32.mrf.mxu0  ;;  %v1038_v62 = vpop.f32.mrf.mxu1 }
  0xf0   :  { %853 = vst [vmem:[#allocation2 + $0x38] sm:$0xff] %v821_v57  ;;  %v819_v0 = vadd.f32 %v1479_v33, %v782_v58  ;;  %v787_v1 = vmul.f32 %v1471_v28, %v750_v59  ;;  %v748_v2 = vadd.f32 %v716_v56, %v614_v60  ;;  %v625_v3 = vadd.f32 %v1038_v62, %v990_v20 }
  0xf1   :  { %v1515_v4 = vpop.f32.mrf.mxu0  ;;  %v616_v5 = vpop.f32.mrf.mxu1 }
  0xf2   :  { %851 = vst [vmem:[#allocation2 + $0x28] sm:$0xff] %v819_v0  ;;  %v824_v7 = vadd.f32 %v1479_v33, %v787_v1  ;;  %v785_v8 = vmul.f32 %v1471_v28, %v748_v2  ;;  %v751_v9 = vadd.f32 %v719_v63, %v625_v3  ;;  %v617_v14 = vadd.f32 %v616_v5, %v311_v21  ;;  %v720_v21 = vld [vmem:[%s1699_s3 + $0x60] sm:$0xff] }
  0xf3   :  { %v1522_v15 = vpop.f32.mrf.mxu0  ;;  %v1041_v16 = vpop.f32.mrf.mxu1 }
  0xf4   :  { %856 = vst [vmem:[#allocation2 + $0x50] sm:$0xff] %v824_v7  ;;  %v822_v18 = vadd.f32 %v1479_v33, %v785_v8  ;;  %v788_v19 = vmul.f32 %v1471_v28, %v751_v9  ;;  %v749_v20 = vadd.f32 %v717_v6, %v617_v14  ;;  %v638_v24 = vadd.f32 %v1041_v16, %v1459_v22  ;;  %v723_v22 = vld [vmem:[%s1699_s3 + $0x78] sm:$0xff] }
  0xf5   :  { %v1530_v25 = vpop.f32.mrf.mxu0  ;;  %v629_v26 = vpop.f32.mrf.mxu1 }
  0xf6   :  { %854 = vst [vmem:[#allocation2 + $0x40] sm:$0xff] %v822_v18  ;;  %v825_v29 = vadd.f32 %v1479_v33, %v788_v19  ;;  %v786_v30 = vmul.f32 %v1471_v28, %v749_v20  ;;  %v754_v31 = vadd.f32 %v722_v17, %v638_v24  ;;  %v630_v32 = vadd.f32 %v629_v26, %v1461_v23  ;;  %v721_v23 = vld [vmem:[%s1699_s3 + $0x68] sm:$0xff] }
  0xf7   :  { %v1538_v35 = vpop.f32.mrf.mxu0  ;;  %v1042_v36 = vpop.f32.mrf.mxu1 }
  0xf8   :  { %857 = vst [vmem:[#allocation2 + $0x58] sm:$0xff] %v825_v29  ;;  %v823_v37 = vadd.f32 %v1479_v33, %v786_v30  ;;  %v791_v38 = vmul.f32 %v1471_v28, %v754_v31  ;;  %v752_v39 = vadd.f32 %v720_v21, %v630_v32  ;;  %v641_v41 = vadd.f32 %v1042_v36, %v1466_v27  ;;  %v726_v27 = vld [vmem:[%s1699_s3 + $0x90] sm:$0xff] }
  0xf9   :  { %v1546_v42 = vpop.f32.mrf.mxu0  ;;  %v632_v43 = vpop.f32.mrf.mxu1 }
  0xfa   :  { %855 = vst [vmem:[#allocation2 + $0x48] sm:$0xff] %v823_v37  ;;  %v828_v44 = vadd.f32 %v1479_v33, %v791_v38  ;;  %v789_v45 = vmul.f32 %v1471_v28, %v752_v39  ;;  %v755_v46 = vadd.f32 %v723_v22, %v641_v41  ;;  %v633_v48 = vadd.f32 %v632_v43, %v1481_v34  ;;  %v724_v34 = vld [vmem:[%s1699_s3 + $0x80] sm:$0xff] }
  0xfb   :  { %v1554_v49 = vpop.f32.mrf.mxu0  ;;  %v1045_v50 = vpop.f32.mrf.mxu1 }
  0xfc   :  { %860 = vst [vmem:[#allocation2 + $0x70] sm:$0xff] %v828_v44  ;;  %v826_v51 = vadd.f32 %v1479_v33, %v789_v45  ;;  %v792_v52 = vmul.f32 %v1471_v28, %v755_v46  ;;  %v753_v53 = vadd.f32 %v721_v23, %v633_v48  ;;  %v654_v55 = vadd.f32 %v1045_v50, %v1487_v40  ;;  %v727_v40 = vld [vmem:[%s1699_s3 + $0x98] sm:$0xff] }
  0xfd   :  { %v1562_v56 = vpop.f32.mrf.mxu0  ;;  %v645_v57 = vpop.f32.mrf.mxu1 }
  0xfe   :  { %858 = vst [vmem:[#allocation2 + $0x60] sm:$0xff] %v826_v51  ;;  %v829_v58 = vadd.f32 %v1479_v33, %v792_v52  ;;  %v790_v59 = vmul.f32 %v1471_v28, %v753_v53  ;;  %v758_v60 = vadd.f32 %v726_v27, %v654_v55  ;;  %v646_v62 = vadd.f32 %v645_v57, %v1494_v47  ;;  %v725_v47 = vld [vmem:[%s1699_s3 + $0x88] sm:$0xff] }
  0xff   :  { %v1570_v63 = vpop.f32.mrf.mxu0  ;;  %v1046_v0 = vpop.f32.mrf.mxu1  ;;  %v729_v27 = vld [vmem:[%s1699_s3 + $0xa8] sm:$0xff] }
 0x100   :  { %861 = vst [vmem:[#allocation2 + $0x78] sm:$0xff] %v829_v58  ;;  %v827_v1 = vadd.f32 %v1479_v33, %v790_v59  ;;  %v795_v2 = vmul.f32 %v1471_v28, %v758_v60  ;;  %v756_v3 = vadd.f32 %v724_v34, %v646_v62  ;;  %v657_v5 = vadd.f32 %v1046_v0, %v1501_v54  ;;  %v730_v54 = vld [vmem:[%s1699_s3 + $0xb0] sm:$0xff]  ;;  %v711_v62 = vld [vmem:[%s1699_s3 + $0x18] sm:$0xff] }
 0x101   :  { %v1578_v6 = vpop.f32.mrf.mxu0  ;;  %v648_v7 = vpop.f32.mrf.mxu1  ;;  %v734_v58 = vld [vmem:[%s1699_s3 + $0xd0] sm:$0xff] }
 0x102   :  { %859 = vst [vmem:[#allocation2 + $0x68] sm:$0xff] %v827_v1  ;;  %v832_v8 = vadd.f32 %v1479_v33, %v795_v2  ;;  %v793_v9 = vmul.f32 %v1471_v28, %v756_v3  ;;  %v759_v14 = vadd.f32 %v727_v40, %v657_v5  ;;  %v649_v16 = vadd.f32 %v648_v7, %v1508_v61  ;;  %v728_v61 = vld [vmem:[%s1699_s3 + $0xa0] sm:$0xff] }
 0x103   :  { %v1586_v17 = vpop.f32.mrf.mxu0  ;;  %v1049_v18 = vpop.f32.mrf.mxu1  ;;  %v732_v3 = vld [vmem:[%s1699_s3 + $0xc0] sm:$0xff] }
 0x104   :  { %864 = vst [vmem:[#allocation2 + $0x90] sm:$0xff] %v832_v8  ;;  %v830_v19 = vadd.f32 %v1479_v33, %v793_v9  ;;  %v796_v20 = vmul.f32 %v1471_v28, %v759_v14  ;;  %v757_v24 = vadd.f32 %v725_v47, %v649_v16  ;;  %v670_v26 = vadd.f32 %v1049_v18, %v1515_v4  ;;  %v731_v4 = vld [vmem:[%s1699_s3 + $0xb8] sm:$0xff] }
 0x105   :  { %v1594_v21 = vpop.f32.mrf.mxu0  ;;  %v661_v29 = vpop.f32.mrf.mxu1 }
 0x106   :  { %862 = vst [vmem:[#allocation2 + $0x80] sm:$0xff] %v830_v19  ;;  %v833_v30 = vadd.f32 %v1479_v33, %v796_v20  ;;  %v794_v31 = vmul.f32 %v1471_v28, %v757_v24  ;;  %v762_v32 = vadd.f32 %v730_v54, %v670_v26  ;;  %v662_v36 = vadd.f32 %v661_v29, %v1522_v15  ;;  %v710_v15 = vld [vmem:[%s1699_s3 + $0x10] sm:$0xff]  ;;  %v735_v54 = vld [vmem:[%s1699_s3 + $0xd8] sm:$0xff]  ;;  %v733_v29 = vld [vmem:[%s1699_s3 + $0xc8] sm:$0xff] }
 0x107   :  { %v1602_v22 = vpop.f32.mrf.mxu0  ;;  %v1050_v37 = vpop.f32.mrf.mxu1 }
 0x108   :  { %865 = vst [vmem:[#allocation2 + $0x98] sm:$0xff] %v833_v30  ;;  %v831_v38 = vadd.f32 %v1479_v33, %v794_v31  ;;  %v799_v39 = vmul.f32 %v1471_v28, %v762_v32  ;;  %v760_v41 = vadd.f32 %v728_v61, %v662_v36  ;;  %v673_v43 = vadd.f32 %v1050_v37, %v1530_v25  ;;  %v708_v25 = vld [vmem:[%s1699_s3] sm:$0xff] }
 0x109   :  { %v1029_v23 = vpop.f32.mrf.mxu0  ;;  %v664_v44 = vpop.f32.mrf.mxu1 }
 0x10a   :  { %863 = vst [vmem:[#allocation2 + $0x88] sm:$0xff] %v831_v38  ;;  %v836_v45 = vadd.f32 %v1479_v33, %v799_v39  ;;  %v797_v46 = vmul.f32 %v1471_v28, %v760_v41  ;;  %v590_v48 = vadd.f32 %v1029_v23, %v1451_v10  ;;  %v763_v50 = vadd.f32 %v731_v4, %v673_v43  ;;  %v738_v4 = vld [vmem:[%s1699_s3 + $0xf0] sm:$0xff] }
 0x10b   :  { %v581_v51 = vpop.f32.mrf.mxu0  ;;  %v665_v52 = vadd.f32 %v664_v44, %v1538_v35  ;;  %v1053_v53 = vpop.f32.mrf.mxu1  ;;  %v736_v44 = vld [vmem:[%s1699_s3 + $0xe0] sm:$0xff] }
 0x10c   :  { %868 = vst [vmem:[#allocation2 + $0xb0] sm:$0xff] %v836_v45  ;;  %v834_v55 = vadd.f32 %v1479_v33, %v797_v46  ;;  %v742_v57 = vadd.f32 %v710_v15, %v590_v48  ;;  %v800_v34 = vmul.f32 %v1471_v28, %v763_v50  ;;  %v582_v10 = vadd.f32 %v581_v51, %v1453_v11  ;;  %v739_v51 = vld [vmem:[%s1699_s3 + $0xf8] sm:$0xff] }
 0x10d   :  { %v761_v59 = vadd.f32 %v729_v27, %v665_v52  ;;  %v1030_v60 = vpop.f32.mrf.mxu0  ;;  %v686_v35 = vadd.f32 %v1053_v53, %v1546_v42  ;;  %v677_v0 = vpop.f32.mrf.mxu1  ;;  %v709_v42 = vld [vmem:[%s1699_s3 + $0x8] sm:$0xff] }
 0x10e   :  { %866 = vst [vmem:[#allocation2 + $0xa0] sm:$0xff] %v834_v55  ;;  %v779_v40 = vmul.f32 %v1471_v28, %v742_v57  ;;  %v837_v1 = vadd.f32 %v1479_v33, %v800_v34  ;;  %v740_v2 = vadd.f32 %v708_v25, %v582_v10  ;;  %v593_v11 = vadd.f32 %v1030_v60, %v1455_v12 }
 0x10f   :  { %v798_v5 = vmul.f32 %v1471_v28, %v761_v59  ;;  %v766_v7 = vadd.f32 %v734_v58, %v686_v35  ;;  %v584_v47 = vpop.f32.mrf.mxu0  ;;  %v678_v8 = vadd.f32 %v677_v0, %v1554_v49  ;;  %v1054_v9 = vpop.f32.mrf.mxu1 }
 0x110   :  { %v816_v14 = vadd.f32 %v1479_v33, %v779_v40  ;;  %869 = vst [vmem:[#allocation2 + $0xb8] sm:$0xff] %v837_v1  ;;  %v777_v12 = vmul.f32 %v1471_v28, %v740_v2  ;;  %v743_v16 = vadd.f32 %v711_v62, %v593_v11  ;;  %v585_v18 = vadd.f32 %v584_v47, %v1457_v13 }
 0x111   :  { %v835_v19 = vadd.f32 %v1479_v33, %v798_v5  ;;  %v803_v20 = vmul.f32 %v1471_v28, %v766_v7  ;;  %v764_v24 = vadd.f32 %v732_v3, %v678_v8  ;;  %v689_v49 = vadd.f32 %v1054_v9, %v1562_v56  ;;  %v680_v26 = vpop.f32.mrf.mxu1 }
 0x112   :  { %848 = vst [vmem:[#allocation2 + $0x10] sm:$0xff] %v816_v14  ;;  %v814_v61 = vadd.f32 %v1479_v33, %v777_v12  ;;  %v780_v13 = vmul.f32 %v1471_v28, %v743_v16  ;;  %v741_v30 = vadd.f32 %v709_v42, %v585_v18  ;;  %v681_v31 = vadd.f32 %v680_v26, %v1570_v63 }
 0x113   :  { %867 = vst [vmem:[#allocation2 + $0xa8] sm:$0xff] %v835_v19  ;;  %v840_v32 = vadd.f32 %v1479_v33, %v803_v20  ;;  %v801_v36 = vmul.f32 %v1471_v28, %v764_v24  ;;  %v767_v37 = vadd.f32 %v735_v54, %v689_v49  ;;  %v1057_v56 = vpop.f32.mrf.mxu1 }
 0x114   :  { %846 = vst [vmem:[#allocation2] sm:$0xff] %v814_v61  ;;  %v817_v38 = vadd.f32 %v1479_v33, %v780_v13  ;;  %v778_v39 = vmul.f32 %v1471_v28, %v741_v30  ;;  %v765_v41 = vadd.f32 %v733_v29, %v681_v31  ;;  %v702_v43 = vadd.f32 %v1057_v56, %v1578_v6 }
 0x115   :  { %872 = vst [vmem:[#allocation2 + $0xd0] sm:$0xff] %v840_v32  ;;  %v838_v63 = vadd.f32 %v1479_v33, %v801_v36  ;;  %v804_v23 = vmul.f32 %v1471_v28, %v767_v37  ;;  %v693_v15 = vpop.f32.mrf.mxu1 }
 0x116   :  { %849 = vst [vmem:[#allocation2 + $0x18] sm:$0xff] %v817_v38  ;;  %v815_v45 = vadd.f32 %v1479_v33, %v778_v39  ;;  %v802_v46 = vmul.f32 %v1471_v28, %v765_v41  ;;  %v770_v48 = vadd.f32 %v738_v4, %v702_v43  ;;  %v694_v50 = vadd.f32 %v693_v15, %v1586_v17  ;;  %v737_v17 = vld [vmem:[%s1699_s3 + $0xe8] sm:$0xff]  ;;  %s1103_s3 = scalar_lea.vmem %s884_s14, 4096 }
 0x117   :  { %870 = vst [vmem:[#allocation2 + $0xc0] sm:$0xff] %v838_v63  ;;  %v841_v6 = vadd.f32 %v1479_v33, %v804_v23  ;;  %v1058_v27 = vpop.f32.mrf.mxu1  ;;  %p1104_p0 = scmp.ne.s32.totalorder %s884_s14, %s1103_s3  ;;  %p1109_p2 = scmp.lt.s32.totalorder %s1103_s3, %s1103_s3 }
 0x118   :  { %847 = vst [vmem:[#allocation2 + $0x8] sm:$0xff] %v815_v45  ;;  %v839_v25 = vadd.f32 %v1479_v33, %v802_v46  ;;  %v807_v52 = vmul.f32 %v1471_v28, %v770_v48  ;;  %v768_v53 = vadd.f32 %v736_v44, %v694_v50  ;;  %v705_v55 = vadd.f32 %v1058_v27, %v1594_v21 }
 0x119   :  { %873 = vst [vmem:[#allocation2 + $0xd8] sm:$0xff] %v841_v6  ;;  %v696_v57 = vpop.f32.mrf.mxu1  ;;  %p1110_p3 = por %p1109_p2, %p1108_p1 }
 0x11a   :  { %871 = vst [vmem:[#allocation2 + $0xc8] sm:$0xff] %v839_v25  ;;  %v844_v34 = vadd.f32 %v1479_v33, %v807_v52  ;;  %v805_v10 = vmul.f32 %v1471_v28, %v768_v53  ;;  %v771_v58 = vadd.f32 %v739_v51, %v705_v55  ;;  %v697_v59 = vadd.f32 %v696_v57, %v1602_v22 }
 0x11b   :  { %p1111_p4 = pnand %p1110_p3, %p1104_p0 }
 0x11c   :  { %876 = vst [vmem:[#allocation2 + $0xf0] sm:$0xff] %v844_v34  ;;  %v842_v60 = vadd.f32 %v1479_v33, %v805_v10  ;;  %v808_v62 = vmul.f32 %v1471_v28, %v771_v58  ;;  %v769_v21 = vadd.f32 %v737_v17, %v697_v59 }
 0x11e   :  { %874 = vst [vmem:[#allocation2 + $0xe0] sm:$0xff] %v842_v60  ;;  %v845_v35 = vadd.f32 %v1479_v33, %v808_v62  ;;  %v806_v0 = vmul.f32 %v1471_v28, %v769_v21 }
 0x120   :  { %877 = vst [vmem:[#allocation2 + $0xf8] sm:$0xff] %v845_v35  ;;  %v843_v40 = vadd.f32 %v1479_v33, %v806_v0 }
 0x122   :  { %875 = vst [vmem:[#allocation2 + $0xe8] sm:$0xff] %v843_v40 }
 0x123   :  { %1114 = shalt.err (!%p1111_p4)
}
 0x124   :  { %s1126_s6 = smov 128   ;;  %s1127_s15 = smov 8  }
 0x125   :  { %889 = dma.vmem_to_hbm [thread:$0]  %s884_s14, 4096, %s1703_s7, [#allocation3], %s1126_s6, %s1126_s6, %s1127_s15  }
 0x126   :  { %1123 = dma.done.wait [#allocation3], 4096  }
 0x127   :  { %1124 = vsyncadd [#allocation3], 4294963200 }
 0x128   :  { %893 = vsyncpa [#allocation3], 1 }

</bundles_post_ra>
